<compile_context>
chip_gen: v7x
topology: tpu7x:2x2x1
jax: 0.10.0
libtpu: 0.0.40
codegen_flags: <defaults>
</compile_context>

<pallas_src>
import math
from functools import partial

import jax
import jax.numpy as jnp
from jax import lax
from jax.experimental import pallas as pl
from jax.experimental.pallas import tpu as pltpu


def _conv1d_same_kernel(x_ref, w_ref, b_ref, o_ref, *,
                        K, dilation, padding, l_out):
    # x_ref: (1, C_in, L)       NCL block; L on the lane axis (lane-dense)
    # w_ref: (C_out, K*C_in)    taps folded into the contraction axis
    # b_ref: (C_out, 1)
    # o_ref: (1, C_out, l_out)  stride-1 output length (lane-dense)
    x = x_ref[0]                                            # (C_in, L)
    c_in = x.shape[0]

    # In-kernel 'same' zero padding along the lane (L) axis.
    if padding > 0:
        z = jnp.zeros((c_in, padding), x.dtype)
        x = jnp.concatenate([z, x, z], axis=1)              # (C_in, L_pad)

    # im2col: stack the K dilated taps on the contraction (sublane) axis so
    # the whole conv is a single MXU matmul instead of K dots + K adds.
    taps = [x[:, k * dilation:k * dilation + l_out] for k in range(K)]
    slab = jnp.concatenate(taps, axis=0) if K > 1 else taps[0]   # (K*C_in, l_out)

    acc = jnp.dot(w_ref[...], slab,
                  preferred_element_type=jnp.float32)       # (C_out, l_out)
    o_ref[0] = (acc + b_ref[...]).astype(o_ref.dtype)       # single bias add


@partial(jax.jit, static_argnames=("stride", "dilation"))
def conv1d_same(x, w, b, *, stride=1, dilation=1):
    """x: (N, C_in, L) float32, w: (C_out, C_in, K), b: (C_out,). Returns NCL."""
    N, C_in, L = x.shape
    C_out, _, K = w.shape

    cut_last_element = (K % 2 == 0) and stride == 1 and (dilation % 2 == 1)
    # nn.Conv1d forbids negative padding; clamp defensively (matches valid configs).
    padding = max(0, math.ceil((1 - stride + dilation * (K - 1)) / 2))
    L_pad = L + 2 * padding
    L_out1 = L_pad - dilation * (K - 1)                  # stride-1 output positions

    # Tiny weight/bias re-layouts (weights only, negligible cost).
    # w2[co, k*C_in + ci] = w[co, ci, k]  -> matches the im2col slab ordering.
    w2 = jnp.transpose(w, (0, 2, 1)).reshape(C_out, K * C_in)
    b2 = b.reshape(C_out, 1)

    kernel = partial(_conv1d_same_kernel, K=K, dilation=dilation,
                     padding=padding, l_out=L_out1)

    out = pl.pallas_call(
        kernel,
        out_shape=jax.ShapeDtypeStruct((N, C_out, L_out1), x.dtype),
        grid=(N,),
        in_specs=[
            pl.BlockSpec((1, C_in, L), lambda n: (n, 0, 0)),      # NCL, L on lanes
            pl.BlockSpec((C_out, K * C_in), lambda n: (0, 0)),
            pl.BlockSpec((C_out, 1), lambda n: (0, 0)),
        ],
        out_specs=pl.BlockSpec((1, C_out, L_out1), lambda n: (n, 0, 0)),
        compiler_params=pltpu.CompilerParams(
            dimension_semantics=("parallel",),
            vmem_limit_bytes=32 * 1024 * 1024),
    )(x, w2, b2)

    if stride > 1:
        # Decimate to the strided output positions (kernel computed the
        # stride-1 grid with the same padding); avoids strided loads in-kernel.
        out = out[:, :, ::stride]
    if cut_last_element:
        out = out[:, :, :-1]
    return out


def _reference(x, w, b, *, stride, dilation, padding, cut_last_element):
    out = lax.conv_general_dilated(
        x, w, window_strides=(stride,), padding=[(padding, padding)],
        rhs_dilation=(dilation,),
        dimension_numbers=("NCH", "OIH", "NCH"),
        precision=lax.Precision.HIGHEST)
    out = out + b[None, :, None]
    if cut_last_element:
        out = out[:, :, :-1]
    return out


def _check_config(key, *, N, C_in, C_out, K, L, stride, dilation):
    kx, kw, kb = jax.random.split(key, 3)
    x = jax.random.normal(kx, (N, C_in, L), dtype=jnp.float32)
    bound = 1.0 / math.sqrt(C_in * K)
    w = jax.random.uniform(kw, (C_out, C_in, K),
                           minval=-bound, maxval=bound, dtype=jnp.float32)
    b = jax.random.uniform(kb, (C_out,),
                           minval=-bound, maxval=bound, dtype=jnp.float32)

    out = conv1d_same(x, w, b, stride=stride, dilation=dilation)
    out = jax.block_until_ready(out)

    padding = max(0, math.ceil((1 - stride + dilation * (K - 1)) / 2))
    cut = (K % 2 == 0) and stride == 1 and (dilation % 2 == 1)
    ref = _reference(x, w, b, stride=stride, dilation=dilation,
                     padding=padding, cut_last_element=cut)
    assert out.shape == ref.shape, (out.shape, ref.shape)
    assert jnp.allclose(out, ref, atol=1e-5, rtol=1e-5), (
        f"mismatch vs reference conv (K={K}, s={stride}, d={dilation})")
    return out


if __name__ == "__main__":
    key = jax.random.PRNGKey(0)
    k0, k1, k2 = jax.random.split(key, 3)

    # Primary module config: Conv1dSame(in_channels=4, out_channels=8, kernel_size=4)
    out = _check_config(k0, N=2, C_in=4, C_out=8, K=4, L=16, stride=1, dilation=1)
    assert out.shape == (2, 8, 16), out.shape   # 'same' output length

    # Exercise the dilation path (odd K, no cut).
    _check_config(k1, N=2, C_in=4, C_out=8, K=3, L=16, stride=1, dilation=2)

    # Exercise the stride path (wrapper-side decimation).
    _check_config(k2, N=2, C_in=4, C_out=8, K=4, L=16, stride=2, dilation=1)

    print("KERNEL_OK")
</pallas_src>

<mosaic_0001>
module attributes {stable_mosaic.version = 11 : i64} {
  func.func @_conv1d_same_kernel(%arg0: i32, %arg1: memref<1x4x16xf32, #tpu.memory_space<vmem>>, %arg2: memref<8x16xf32, #tpu.memory_space<vmem>>, %arg3: memref<8x1xf32, #tpu.memory_space<vmem>>, %arg4: memref<1x8x17xf32, #tpu.memory_space<vmem>>) attributes {dimension_semantics = [#tpu.dimension_semantics<parallel>], iteration_bounds = array<i64: 2>, scalar_prefetch = 0 : i64, scratch_operands = 0 : i64, tpu.core_type = #tpu.core_type<tc>, window_params = [{transform_indices = @transform_0, window_bounds = array<i64: 1, 4, 16>}, {pipeline_mode = #tpu.pipeline_mode<synchronous>, transform_indices = @transform_1, window_bounds = array<i64: 8, 16>}, {pipeline_mode = #tpu.pipeline_mode<synchronous>, transform_indices = @transform_2, window_bounds = array<i64: 8, 1>}, {transform_indices = @transform_3, window_bounds = array<i64: 1, 8, 17>}]} {
    %c0 = arith.constant 0 : index
    %c0_0 = arith.constant 0 : index
    %c0_1 = arith.constant 0 : index
    %0 = vector.load %arg1[%c0, %c0_0, %c0_1] : memref<1x4x16xf32, #tpu.memory_space<vmem>>, vector<1x4x16xf32>
    %1 = vector.shape_cast %0 : vector<1x4x16xf32> to vector<4x16xf32>
    %cst = arith.constant 0.000000e+00 : f32
    %2 = vector.broadcast %cst : f32 to vector<4x2xf32>
    %3 = tpu.concatenate %2, %1, %2 in 1 : vector<4x2xf32>, vector<4x16xf32>, vector<4x2xf32> -> vector<4x20xf32>
    %4 = vector.extract_strided_slice %3 {offsets = [0, 0], sizes = [4, 17], strides = [1, 1]} : vector<4x20xf32> to vector<4x17xf32>
    %5 = vector.extract_strided_slice %3 {offsets = [0, 1], sizes = [4, 17], strides = [1, 1]} : vector<4x20xf32> to vector<4x17xf32>
    %6 = vector.extract_strided_slice %3 {offsets = [0, 2], sizes = [4, 17], strides = [1, 1]} : vector<4x20xf32> to vector<4x17xf32>
    %7 = vector.extract_strided_slice %3 {offsets = [0, 3], sizes = [4, 17], strides = [1, 1]} : vector<4x20xf32> to vector<4x17xf32>
    %8 = tpu.concatenate %4, %5, %6, %7 in 0 : vector<4x17xf32>, vector<4x17xf32>, vector<4x17xf32>, vector<4x17xf32> -> vector<16x17xf32>
    %c0_2 = arith.constant 0 : index
    %c0_3 = arith.constant 0 : index
    %9 = vector.load %arg2[%c0_2, %c0_3] : memref<8x16xf32, #tpu.memory_space<vmem>>, vector<8x16xf32>
    %cst_4 = arith.constant dense<0.000000e+00> : vector<8x17xf32>
    %10 = tpu.matmul %9, %8, %cst_4 {dimension_numbers = #tpu.dot_dimension_numbers<[1], [0], [0], [1], [0, 0, 1, 1], [], []>} : vector<8x16xf32>, vector<16x17xf32>, vector<8x17xf32> -> vector<8x17xf32>
    %c0_5 = arith.constant 0 : index
    %c0_6 = arith.constant 0 : index
    %11 = vector.load %arg3[%c0_5, %c0_6] : memref<8x1xf32, #tpu.memory_space<vmem>>, vector<8x1xf32>
    %12 = vector.broadcast %11 : vector<8x1xf32> to vector<8x17xf32>
    %13 = arith.addf %10, %12 : vector<8x17xf32>
    %c0_7 = arith.constant 0 : index
    %c0_8 = arith.constant 0 : index
    %c0_9 = arith.constant 0 : index
    %14 = vector.load %arg4[%c0_7, %c0_8, %c0_9] : memref<1x8x17xf32, #tpu.memory_space<vmem>>, vector<1x8x17xf32>
    %15 = vector.shape_cast %14 : vector<1x8x17xf32> to vector<8x17xf32>
    %16 = vector.shape_cast %13 : vector<8x17xf32> to vector<1x8x17xf32>
    tpu.vector_store %arg4[%c0_7, %c0_8, %c0_9], %16 {strides = array<i32>} : memref<1x8x17xf32, #tpu.memory_space<vmem>>, vector<1x8x17xf32>,
    return
  }
  func.func @transform_0(%arg0: i32) -> (i32, i32, i32) {
    %c0_i32 = arith.constant 0 : i32
    %c0_i32_0 = arith.constant 0 : i32
    %c0_i32_1 = arith.constant 0 : i32
    return %arg0, %c0_i32, %c0_i32_0 : i32, i32, i32
  }
  func.func @transform_1(%arg0: i32) -> (i32, i32) {
    %c0_i32 = arith.constant 0 : i32
    %c0_i32_0 = arith.constant 0 : i32
    %c0_i32_1 = arith.constant 0 : i32
    return %c0_i32, %c0_i32_0 : i32, i32
  }
  func.func @transform_2(%arg0: i32) -> (i32, i32) {
    %c0_i32 = arith.constant 0 : i32
    %c0_i32_0 = arith.constant 0 : i32
    %c0_i32_1 = arith.constant 0 : i32
    return %c0_i32, %c0_i32_0 : i32, i32
  }
  func.func @transform_3(%arg0: i32) -> (i32, i32, i32) {
    %c0_i32 = arith.constant 0 : i32
    %c0_i32_0 = arith.constant 0 : i32
    %c0_i32_1 = arith.constant 0 : i32
    return %arg0, %c0_i32, %c0_i32_0 : i32, i32, i32
  }
}

</mosaic_0001>

<bundles_post_ra>
// kernel: conv1d_same.1
= control target key start
LH: loop header
LB: loop body
LE: loop exit
PB: predicated region body
PF: predicated region fallthrough
CT: control target
= control target key end

     0   :  { %8 = vsyncpa [#allocation3], 0  ;;  %s616_s0 = inlined_call_operand.vmem [shape: f32[2,4,16], index: 0, kind: input, shape index: {}]   ;;  %s617_s1 = inlined_call_operand.vmem [shape: f32[8,16], index: 1, kind: input, shape index: {}]   ;;  %s618_s2 = inlined_call_operand.vmem [shape: f32[8,1], index: 2, kind: input, shape index: {}]   ;;  %s619_s3 = inlined_call_operand.hbm [shape: f32[2,8,17], index: 3, kind: output, shape index: {}]  }
   0x1   :  { %10 = vsyncpa [#allocation3 + $0x1], 0  ;;  %s510_s12 = smov 0   ;;  %s512_s13 = smov 0  }
   0x2   :  { %s514_s14 = smov 0   ;;  %s516_s15 = smov 0  }
   0x3 LB: > { %s531_s16 = sadd.s32 4294967295, %s479_s15   ;;  %s345_s17 = sadd.s32 4294967294, %s479_s15   ;;  %s479_s15 = sphi %s516_s15, %s625_s15   ;;  %s475_s14 = sphi %s514_s14, %s624_s14   ;;  %s471_s13 = sphi %s512_s13, %s623_s13   ;;  %s467_s12 = sphi %s510_s12, %s622_s12  }
   0x4   : > { %s535_s18 = sadd.s32 1, %s479_s15   ;;  %s91_s19 = sadd.s32 1, %s475_s14 }
   0x5   : > { %s88_s20 = ssub.s32 %s479_s15, %s535_s18  ;;  %p101_p0 = scmp.ne.s32.totalorder %s475_s14, %s471_s13 }
   0x6   : > { %p89_p1 = scmp.eq.s32.totalorder %s88_s20, 0  ;;  %p102_p2 = scmp.eq.s32.totalorder %s531_s16, 1 }
   0x7   : > { %p107_p3 = scmp.ne.s32.totalorder %s471_s13, %s467_s12  ;;  %p108_p4 = scmp.eq.s32.totalorder %s345_s17, 1 }
   0x8   : > { %s546_s21 = scalar_select %p89_p1, %s475_s14, %s91_s19  }
   0x9   : > { %p548_p5 = por %p102_p2, %p101_p0  ;;  %p552_p6 = por %p108_p4, %p107_p3 }
   0xa   : > { %p348_p7 = scmp.ge.s32.totalorder %s479_s15, 1  ;;  %p139_p8 = scmp.lt.s32.totalorder %s479_s15, 3 }
   0xc   : > { %p140_p9 = pnand %p348_p7, %p139_p8 }
   0xd   : > { %p162_p10 = scmp.lt.s32.totalorder (!%p140_p9), %s531_s16, 1  ;;  %s481_s29 = smov (!%p140_p9), 2   ;;  %v482_v1 = vmov (!%p140_p9), 0.0|0.0   ;;  %vm171_vm0 = vcmask (!%p140_p9), 15360   ;;  %vm483_vm1 = vmmov (!%p140_p9), 0   ;;  %v484_v2 = vmov (!%p140_p9), 0.0  }
   0xe   : > { %143 = sbr.rel (%p140_p9) target bundleno = 496 (0x1f0), region = 32  ;;  %366 = vmatprep.subr.bf16.mxu0 (!%p140_p9), %v482_v1  ;;  %363 = vmatprep.mubr.msk.f32.mxu0 (!%p140_p9), %vm483_vm1, %v484_v2  ;;  %vm173_vm2 = vcmask (!%p140_p9), 146432   ;;  %v485_v5 = vmov (!%p140_p9), 0   ;;  %s486_s30 = smov (!%p140_p9), 126   ;;  %v190_v8 = vld [vmem:[%s618_s2] sm:$0xff] (!%p140_p9)  ;;  %vm186_vm3 = vcmask (!%p140_p9), 1043456  }
   0xf   : > { %416 = vset.pattern.permute.xlu0 (!%p140_p9), %v485_v5  ;;  %s487_s4 = smov (!%p140_p9), 127   ;;  %s488_s7 = smov (!%p140_p9), 125   ;;  %v189_v15 = vld [vmem:[%s617_s1] sm:$0xff] (!%p140_p9)  ;;  %vm196_vm4 = vcmask (!%p140_p9), 130048   ;;  %vm270_vm5 = vcmask (!%p140_p9), 138240  }
  0x10   : > { %s159_s10 = sand.u32 (!%p140_p9), 1, %s471_s13   ;;  %s353_s17 = sshll.u32 (!%p140_p9), %s531_s16, 7 }
  0x11   : > { %s349_s11 = sshll.u32 (!%p140_p9), %s159_s10, 3  ;;  %s574_s26 = scalar_lea.hbm (!%p140_p9), %s619_s3, %s353_s17 }
  0x12   : > { %s161_s19 = scalar_lea.vmem (!%p140_p9), [#allocation2], %s349_s11  ;;  %s273_s27 = scalar_lea.sflag (!%p140_p9), [#allocation3], %s159_s10 }
  0x13   : > { %s286_s20 = sshll.u32 (!%p140_p9), %s161_s19, 4  ;;  %s576_s20 = int_to_ptr.vmem [resolvable:$true] %s286_s20 }
  0x15   : > { %s163_s24 = scalar_select %p162_p10, %s531_s16, 1 }
  0x16   : > { %s489_s16 = smov [#allocation2]  }
  0x17   : > { %s350_s25 = sshll.u32 %s163_s24, 2 }
  0x18   : > { %s165_s28 = scalar_lea.vmem %s616_s0, %s350_s25 }
  0x19   : > { %v166_v0 = vld [vmem:[%s165_s28] sm:$0xf]  ;;  %s417_s28 = scalar_lea.vmem %s576_s20, 128 }
  0x1a   : > { %168 = vrot.lane.b32.xlu0 %v166_v0, %s481_s29  ;;  %p418_p11 = scmp.ne.s32.totalorder %s576_s20, %s417_s28  ;;  %s421_s29 = sshll.u32 %s489_s16, 4  ;;  %s422_s29 = int_to_ptr.vmem [resolvable:$false] %s421_s29 }
  0x1b   : > { %p424_p0 = scmp.lt.s32.totalorder %s576_s20, %s422_s29 }
  0x1c   : > { %p419_p12 = pnand %p418_p11, %p548_p5 }
  0x1e   : > { %p420_p13 = pneg %p419_p12 }
  0x8c   : > { %v169_v3 = vpop.permute.xlu0 %168 }
  0x8d   : > { %v172_v4 = vsel %vm171_vm0, 0.0, %v169_v3 }
  0x8e   : > { %v174_v6 = vsel %vm173_vm2, %v172_v4, 0.0 }
  0x8f   : > { %v176_v7 = vrot.slane %v174_v6, 4  ;;  %180 = vrot.lane.b32.xlu1 %v174_v6, %s486_s30  ;;  %s423_s30 = scalar_lea.vmem %s422_s29, 256 }
  0x90   : > { %p425_p1 = scmp.lt.s32.totalorder %s423_s30, %s417_s28 }
  0x91   : > { %177 = vrot.lane.b32.xlu0 %v176_v7, %s487_s4 }
  0x92   : > { %p426_p2 = por %p425_p1, %p424_p0 }
  0x93   : > { %183 = vrot.lane.b32.xlu1 %v176_v7, %s488_s7 }
  0x94   : > { %p427_p3 = pnand %p426_p2, %p420_p13 }
  0x95   : > { %193 = vperm.xlu0 %416, %v190_v8  }
 0x101   : > { %v181_v9 = vpop.permute.xlu1 %180 }
 0x103   : > { %v178_v10 = vpop.permute.xlu0 %177 }
 0x104   : > { %v187_v12 = vsel %vm186_vm3, %v174_v6, %v178_v10 }
 0x105   : > { %v184_v11 = vpop.permute.xlu1 %183 }
 0x106   : > { %v188_v13 = vsel %vm186_vm3, %v181_v9, %v184_v11 }
 0x107   : > { %v367_v14 = vpack.c.bf16 %v188_v13, %v187_v12 }
 0x109   : > { %368 = vmatpush3.bf16.msra.mxu0 %v367_v14 }
 0x10c   : > { %364 = vmatmul.mubr.msk.f32.vlgmr.msra.gmra.mrb[0].mxu0 %vm196_vm4, %v189_v15 }
 0x114   : > { %v194_v16 = vpop.permute.xlu0 %193 }
 0x1df   : > { %v266_v17 = vpop.f32.mrb[0].mxu0 }
 0x1e0   : > { %v267_v18 = vadd.f32 %v266_v17, %v194_v16  ;;  %v365_v19 = vpop.f32.mrb[1].mxu0 }
 0x1e2   : > { %271 = vst.msk [vmem:[%s161_s19] sm:$0xff] %vm270_vm5, %v267_v18 }
 0x1e3   : > { %430 = shalt.err (!%p427_p3)
}
 0x1e4   : > { %s431_s4 = scalar_lea.hbm %s574_s26, 128  ;;  %s435_s7 = scalar_lea.hbm %s619_s3, 256 }
 0x1e5   : > { %p432_p4 = scmp.ne.s32.totalorder %s574_s26, %s431_s4  ;;  %p436_p9 = scmp.lt.u32.totalorder %s574_s26, %s619_s3 }
 0x1e6   : > { %p437_p10 = scmp.lt.u32.totalorder %s435_s7, %s431_s4  ;;  %p439_p12 = scmp.lt.u32.totalorder %s431_s4, %s574_s26 }
 0x1e7   : > { %p433_p7 = pnand %p432_p4, %p548_p5 }
 0x1e8   : > { %p438_p11 = por %p437_p10, %p436_p9 }
 0x1e9   : > { %p434_p8 = pneg %p433_p7 }
 0x1ea   : > { %p440_p13 = por %p439_p12, %p438_p11 }
 0x1ec   : > { %p441_p0 = pnand %p440_p13, %p434_p8 }
 0x1ee   : > { %444 = shalt.err (!%p441_p0)
}
 0x1ef   : > { %369 = dma.vmem_to_hbm [thread:$0]  (%p548_p5), %s576_s20, 128, %s574_s26, %s273_s27  }
 0x1f0 PF: > { %p375_p1 = scmp.ge.s32.totalorder %s479_s15, 2  ;;  %s298_s10 = sand.u32 1, %s467_s12  }
 0x1f1   : > { %s299_s11 = scalar_lea.sflag [#allocation3], %s298_s10 }
 0x1f2   : > { %p372_p2 = pnand %p375_p1, %p552_p6 }
 0x1f4   : > { %462 = dma.done.wait (!%p372_p2), %s299_s11, 128  }
 0x1f5   : > { %464 = vsyncadd (!%p372_p2), %s299_s11, 4294967168  ;;  %p13_p3 = scmp.ge.s32.totalorder %s535_s18, 4   ;;  %s622_s12 = smov %s471_s13 }
 0x1f6   : > { %s623_s13 = smov %s475_s14  ;;  %s624_s14 = smov %s546_s21 }
 0x1f7   : > { %s625_s15 = smov %s535_s18  ;;  %15 = sbr.rel (!%p13_p3) target bundleno = 3 (0x3), region = 67 }
 0x1fe   :  { %304 = vsyncpa [#allocation3], 1 }
 0x1ff   :  { %306 = vsyncpa [#allocation3 + $0x1], 1 }

</bundles_post_ra>
